<compile_context>
chip_gen: v6e
topology: v6e:2x2x1
jax: 0.10.0
libtpu: 0.0.40
codegen_flags: <defaults>
</compile_context>

<pallas_src>
import jax
import jax.numpy as jnp
from jax import lax
from jax.experimental import pallas as pl
from jax.experimental.pallas import tpu as pltpu


_VMEM_LIMIT_BYTES = 40 * 1024 * 1024  # below v7x's 64 MiB physical, above v5e's 16 MiB default scoped


def _round_up(x: int, m: int) -> int:
    return ((x + m - 1) // m) * m


def _min_sublane(dtype) -> int:
    """Minimum sublane tile for a dtype (8 for 4-byte, 16 for 2-byte, ...)."""
    return {4: 8, 2: 16, 1: 32}.get(jnp.dtype(dtype).itemsize, 8)


# ---------------------------------------------------------------------------
# Kernels
# ---------------------------------------------------------------------------
def dense_tanh_kernel(x_ref, w_ref, b_ref, o_ref):
    """o = tanh(x @ W_t + b) for one (rows, H_in) tile.

    W_t is the nn.Linear weight pre-transposed to (H_in, H_out), so this is a
    plain (1,0) MXU contraction.  x is consumed in its native dtype (bf16
    stays bf16); accumulation / bias add / tanh run in f32.
    """
    y = jnp.dot(x_ref[...], w_ref[...], preferred_element_type=jnp.float32)
    y = y + b_ref[...].astype(jnp.float32)
    o_ref[...] = jnp.tanh(y).astype(o_ref.dtype)


def masked_mean_dense_tanh_kernel(h_ref, m_ref, w_ref, b_ref, o_ref,
                                  sum_ref, den_ref):
    """pool_all branch, streamed over S.

    grid = (B_tiles [parallel], S_tiles [arbitrary reduction])
    h_ref : [TB, TS, H_in]  (native dtype)   m_ref : [TB, TS]  (f32)
    sum_ref: [TB, H_in] f32 accumulator      den_ref: [TB, 1] f32 accumulator
    """
    s = pl.program_id(1)

    @pl.when(s == 0)
    def _init():
        sum_ref[...] = jnp.zeros_like(sum_ref)
        den_ref[...] = jnp.zeros_like(den_ref)

    h = h_ref[...]                          # native dtype -> MXU eats it directly
    m32 = m_ref[...]                        # f32 mask block
    # Mask-weighted sum over S as an MXU batched matvec (mask cast down to the
    # activation dtype; 0/1 values are exact in bf16).
    sum_ref[...] += jnp.einsum("bs,bsh->bh", m32.astype(h.dtype), h,
                               preferred_element_type=jnp.float32)
    den_ref[...] += jnp.sum(m32, axis=1, keepdims=True)

    @pl.when(s == pl.num_programs(1) - 1)
    def _finalize():
        # Like PyTorch: an all-zero mask row divides by zero (NaN).  Rows that
        # only exist because of partial blocks are sliced off by the wrapper,
        # so their NaNs never escape.
        mean = sum_ref[...] / den_ref[...]
        y = jnp.dot(mean.astype(w_ref.dtype), w_ref[...],
                    preferred_element_type=jnp.float32)
        y = y + b_ref[...].astype(jnp.float32)
        o_ref[...] = jnp.tanh(y).astype(o_ref.dtype)


# ---------------------------------------------------------------------------
# Wrappers
# ---------------------------------------------------------------------------
def _dense_tanh(x2, w_t, b2):
    """tanh(x2 @ W_t + b), x2: [M, H_in], tiled over rows (512-row tiles)."""
    M, H_in = x2.shape
    H_out = w_t.shape[1]
    sub = _min_sublane(x2.dtype)
    tile_m = min(512, _round_up(M, sub))          # big tiles amortize per-step overhead
    grid = (pl.cdiv(M, tile_m),)                  # partial tail block handled by Pallas

    return pl.pallas_call(
        dense_tanh_kernel,
        out_shape=jax.ShapeDtypeStruct((M, H_out), x2.dtype),
        grid_spec=pltpu.PrefetchScalarGridSpec(
            num_scalar_prefetch=0,
            grid=grid,
            in_specs=[
                pl.BlockSpec((tile_m, H_in), lambda i: (i, 0)),
                pl.BlockSpec((H_in, H_out), lambda i: (0, 0)),   # weight resident
                pl.BlockSpec((1, H_out), lambda i: (0, 0)),      # bias resident
            ],
            out_specs=pl.BlockSpec((tile_m, H_out), lambda i: (i, 0)),
        ),
        compiler_params=pltpu.CompilerParams(
            dimension_semantics=("parallel",),
            vmem_limit_bytes=_VMEM_LIMIT_BYTES),
    )(x2, w_t, b2)


def _first_token_dense_tanh_fused(hidden_states, w_t, b2):
    """tanh(hidden[:, 0, :] @ W_t + b) with the token-0 gather fused into the
    input BlockSpec (S dim squeezed at index 0) — no separate slice op."""
    B, S, H_in = hidden_states.shape
    H_out = w_t.shape[1]
    sub = _min_sublane(hidden_states.dtype)
    tile_b = min(256, _round_up(B, sub))
    grid = (pl.cdiv(B, tile_b),)

    return pl.pallas_call(
        dense_tanh_kernel,
        out_shape=jax.ShapeDtypeStruct((B, H_out), hidden_states.dtype),
        grid_spec=pltpu.PrefetchScalarGridSpec(
            num_scalar_prefetch=0,
            grid=grid,
            in_specs=[
                # (tile_b, 1, H_in) block fixed at S index 0, S dim squeezed ->
                # the kernel sees a (tile_b, H_in) tile of first-token rows.
                pl.BlockSpec((tile_b, None, H_in), lambda i: (i, 0, 0)),
                pl.BlockSpec((H_in, H_out), lambda i: (0, 0)),   # weight resident
                pl.BlockSpec((1, H_out), lambda i: (0, 0)),      # bias resident
            ],
            out_specs=pl.BlockSpec((tile_b, H_out), lambda i: (i, 0)),
        ),
        compiler_params=pltpu.CompilerParams(
            dimension_semantics=("parallel",),
            vmem_limit_bytes=_VMEM_LIMIT_BYTES),
    )(hidden_states, w_t, b2)


def _first_token_dense_tanh(hidden_states, w_t, b2):
    try:
        return _first_token_dense_tanh_fused(hidden_states, w_t, b2)
    except Exception:
        # Conservative fallback: gather token 0 in the wrapper (one small
        # strided slice) and reuse the 2-D dense path.
        return _dense_tanh(hidden_states[:, 0, :], w_t, b2)


def _pick_seq_tile(S, tile_b, H_in, itemsize):
    """Pick the S tile for the masked-mean reduction.

    Prefers a tile that (a) divides S exactly (no [B, S, H] padding), (b) is
    lane-legal for the [tile_b, tile_s] mask block (multiple of 128 or == S),
    and (c) keeps the hidden block <= ~8 MiB per pipeline buffer so the
    enlarged tiles still fit v7x's smaller VMEM.
    Returns (tile_s, S_pad)."""
    cap = max(128, (8 * 1024 * 1024) // max(1, tile_b * H_in * itemsize))
    for cand in (1024, 512, 256, 128):
        if cand <= cap and cand <= S and S % cand == 0:
            return cand, S
    if S <= cap:                      # small or odd S: whole sequence per step
        return S, S
    # Rare: long ragged S -> pad to a multiple of 128 (padded mask stays zero).
    tile = min(512, (cap // 128) * 128)
    return tile, _round_up(S, tile)


def _masked_mean_dense_tanh(hidden_states, mask, w_t, b2):
    """pool_all branch: masked mean over S, then tanh(dense(.))."""
    B, S, H_in = hidden_states.shape
    H_out = w_t.shape[1]
    dtype = hidden_states.dtype
    itemsize = jnp.dtype(dtype).itemsize

    # Minimal B tile (8 f32 / 16 bf16): maximizes the number of "parallel"
    # B steps so both TensorCores on v7x get work even for modest B.
    tile_b = _min_sublane(dtype)
    # Keep the mask 32-bit in memory ((8,128)-friendly layout, cheap math even
    # on v5e's bf16-less VPU).
    mask32 = mask.astype(jnp.float32)

    tile_s, S_pad = _pick_seq_tile(S, tile_b, H_in, itemsize)
    if S_pad != S:
        # Rare ragged-S fallback: padded mask entries must be genuine zeros so
        # they do not contaminate the reduction of valid rows.
        hidden_states = jnp.pad(hidden_states, ((0, 0), (0, S_pad - S), (0, 0)))
        mask32 = jnp.pad(mask32, ((0, 0), (0, S_pad - S)))

    grid = (pl.cdiv(B, tile_b), S_pad // tile_s)

    return pl.pallas_call(
        masked_mean_dense_tanh_kernel,
        out_shape=jax.ShapeDtypeStruct((B, H_out), dtype),
        grid_spec=pltpu.PrefetchScalarGridSpec(
            num_scalar_prefetch=0,
            grid=grid,
            in_specs=[
                pl.BlockSpec((tile_b, tile_s, H_in), lambda b, s: (b, s, 0)),
                pl.BlockSpec((tile_b, tile_s), lambda b, s: (b, s)),
                pl.BlockSpec((H_in, H_out), lambda b, s: (0, 0)),   # weight resident
                pl.BlockSpec((1, H_out), lambda b, s: (0, 0)),      # bias resident
            ],
            out_specs=pl.BlockSpec((tile_b, H_out), lambda b, s: (b, 0)),
            scratch_shapes=[
                pltpu.VMEM((tile_b, H_in), jnp.float32),   # masked-sum accumulator
                pltpu.VMEM((tile_b, 1), jnp.float32),      # denominator accumulator
            ],
        ),
        compiler_params=pltpu.CompilerParams(
            dimension_semantics=("parallel", "arbitrary"),
            vmem_limit_bytes=_VMEM_LIMIT_BYTES),
    )(hidden_states, mask32, w_t, b2)


def bert_pooler(hidden_states, weight, bias, *, pool_all=False, pool=True,
                mask=None):
    """Pallas implementation of BertPooler.forward.

    hidden_states: [B, S, H_in]
    weight: [H_out, H_in]  (nn.Linear native layout), bias: [H_out]
    mask: [B, S]  (required when pool_all=True)
    """
    H_out = weight.shape[0]
    # One-time layout prep: (H_out, H_in) -> (H_in, H_out) so every kernel step
    # runs a plain (1,0) MXU contraction; give the bias a sublane axis.
    w_t = weight.T
    b2 = bias.reshape(1, H_out)

    if pool_all:
        assert mask is not None, "pool_all=True requires mask"
        return _masked_mean_dense_tanh(hidden_states, mask, w_t, b2)
    if pool:
        return _first_token_dense_tanh(hidden_states, w_t, b2)
    # pool=False: dense+tanh on every token; view as a 2-D [B*S, H_in] problem.
    B, S, H_in = hidden_states.shape
    out = _dense_tanh(hidden_states.reshape(B * S, H_in), w_t, b2)
    return out.reshape(B, S, H_out)


# ---------------------------------------------------------------------------
# Pure-JAX reference (for correctness check)
# ---------------------------------------------------------------------------
def bert_pooler_ref(hidden_states, weight, bias, *, pool_all=False, pool=True,
                    mask=None):
    def dense_tanh(x):
        y = jnp.dot(x, weight.T, precision=lax.Precision.HIGHEST) + bias
        return jnp.tanh(y)

    if not pool_all:
        x = hidden_states[:, 0] if pool else hidden_states
        return dense_tanh(x)
    denom = jnp.sum(mask, axis=1, keepdims=True)
    mean = jnp.sum(hidden_states * mask[:, :, None], axis=1) / denom
    return dense_tanh(mean)


if __name__ == "__main__":
    B, S, H = 4, 8, 32   # small shapes: batch=4, seq=8, hidden=32

    key = jax.random.PRNGKey(0)
    k_h, k_w, k_b, k_m = jax.random.split(key, 4)

    hidden_states = jax.random.normal(k_h, (B, S, H), dtype=jnp.float32)
    # Synthetic nn.Linear(H, H) parameters in PyTorch's (out, in) layout.
    weight = jax.random.normal(k_w, (H, H), dtype=jnp.float32) * (1.0 / (H ** 0.5))
    bias = jax.random.normal(k_b, (H,), dtype=jnp.float32) * 0.02
    # 0/1 attention mask with at least one valid token per row.
    mask = (jax.random.uniform(k_m, (B, S)) > 0.3).astype(jnp.float32)
    mask = mask.at[:, 0].set(1.0)

    # pool_all=False, pool=True (first-token pooling)
    out_first = bert_pooler(hidden_states, weight, bias, pool_all=False, pool=True)
    # pool_all=False, pool=False (dense+tanh on every token)
    out_tok = bert_pooler(hidden_states, weight, bias, pool_all=False, pool=False)
    # pool_all=True (masked mean pooling)
    out_mean = bert_pooler(hidden_states, weight, bias, pool_all=True, mask=mask)
    jax.block_until_ready((out_first, out_tok, out_mean))

    ref_first = bert_pooler_ref(hidden_states, weight, bias, pool_all=False, pool=True)
    ref_tok = bert_pooler_ref(hidden_states, weight, bias, pool_all=False, pool=False)
    ref_mean = bert_pooler_ref(hidden_states, weight, bias, pool_all=True, mask=mask)

    assert out_first.shape == (B, H)
    assert out_tok.shape == (B, S, H)
    assert out_mean.shape == (B, H)
    # Tolerance covers possible reduced-precision (bf16-pass) f32 matmuls on
    # either side of the comparison; structural bugs would be O(1) off.
    assert jnp.allclose(out_first, ref_first, atol=2e-2, rtol=2e-2), "first-token mismatch"
    assert jnp.allclose(out_tok, ref_tok, atol=2e-2, rtol=2e-2), "per-token mismatch"
    assert jnp.allclose(out_mean, ref_mean, atol=2e-2, rtol=2e-2), "masked-mean mismatch"
    assert bool(jnp.isfinite(out_mean).all())

    print("KERNEL_OK")
</pallas_src>

<mosaic_0001>
module attributes {stable_mosaic.version = 11 : i64} {
  func.func @dense_tanh_kernel(%arg0: i32, %arg1: memref<8x32xf32, #tpu.memory_space<vmem>>, %arg2: memref<32x32xf32, #tpu.memory_space<vmem>>, %arg3: memref<1x32xf32, #tpu.memory_space<vmem>>, %arg4: memref<8x32xf32, #tpu.memory_space<vmem>>) attributes {dimension_semantics = [#tpu.dimension_semantics<parallel>], iteration_bounds = array<i64: 1>, scalar_prefetch = 0 : i64, scratch_operands = 0 : i64, tpu.core_type = #tpu.core_type<tc>, window_params = [{transform_indices = @transform_0, window_bounds = array<i64: 8, 32>}, {pipeline_mode = #tpu.pipeline_mode<synchronous>, transform_indices = @transform_1, window_bounds = array<i64: 32, 32>}, {pipeline_mode = #tpu.pipeline_mode<synchronous>, transform_indices = @transform_2, window_bounds = array<i64: 1, 32>}, {transform_indices = @transform_3, window_bounds = array<i64: 8, 32>}]} {
    %c0 = arith.constant 0 : index
    %c0_0 = arith.constant 0 : index
    %0 = vector.load %arg1[%c0, %c0_0] : memref<8x32xf32, #tpu.memory_space<vmem>>, vector<8x32xf32>
    %c0_1 = arith.constant 0 : index
    %c0_2 = arith.constant 0 : index
    %1 = vector.load %arg2[%c0_1, %c0_2] : memref<32x32xf32, #tpu.memory_space<vmem>>, vector<32x32xf32>
    %cst = arith.constant dense<0.000000e+00> : vector<8x32xf32>
    %2 = tpu.matmul %0, %1, %cst {dimension_numbers = #tpu.dot_dimension_numbers<[1], [0], [0], [1], [0, 0, 1, 1], [], []>} : vector<8x32xf32>, vector<32x32xf32>, vector<8x32xf32> -> vector<8x32xf32>
    %c0_3 = arith.constant 0 : index
    %c0_4 = arith.constant 0 : index
    %3 = vector.load %arg3[%c0_3, %c0_4] : memref<1x32xf32, #tpu.memory_space<vmem>>, vector<1x32xf32>
    %4 = vector.broadcast %3 : vector<1x32xf32> to vector<8x32xf32>
    %5 = arith.addf %2, %4 : vector<8x32xf32>
    %6 = math.tanh %5 : vector<8x32xf32>
    %c0_5 = arith.constant 0 : index
    %c0_6 = arith.constant 0 : index
    %7 = vector.load %arg4[%c0_5, %c0_6] : memref<8x32xf32, #tpu.memory_space<vmem>>, vector<8x32xf32>
    tpu.vector_store %arg4[%c0_5, %c0_6], %6 {strides = array<i32>} : memref<8x32xf32, #tpu.memory_space<vmem>>, vector<8x32xf32>,
    return
  }
  func.func @transform_0(%arg0: i32) -> (i32, i32) {
    %c0_i32 = arith.constant 0 : i32
    %c0_i32_0 = arith.constant 0 : i32
    return %arg0, %c0_i32 : i32, i32
  }
  func.func @transform_1(%arg0: i32) -> (i32, i32) {
    %c0_i32 = arith.constant 0 : i32
    %c0_i32_0 = arith.constant 0 : i32
    %c0_i32_1 = arith.constant 0 : i32
    return %c0_i32, %c0_i32_0 : i32, i32
  }
  func.func @transform_2(%arg0: i32) -> (i32, i32) {
    %c0_i32 = arith.constant 0 : i32
    %c0_i32_0 = arith.constant 0 : i32
    %c0_i32_1 = arith.constant 0 : i32
    return %c0_i32, %c0_i32_0 : i32, i32
  }
  func.func @transform_3(%arg0: i32) -> (i32, i32) {
    %c0_i32 = arith.constant 0 : i32
    %c0_i32_0 = arith.constant 0 : i32
    return %arg0, %c0_i32 : i32, i32
  }
}

</mosaic_0001>

<bundles_post_ra>
// kernel: tpu_custom_call.1
= control target key start
LH: loop header
LB: loop body
LE: loop exit
PB: predicated region body
PF: predicated region fallthrough
CT: control target
= control target key end

     0   :  { %8 = vsyncpa [#allocation3], 0  ;;  %s291_s0 = inlined_call_operand.hbm [shape: f32[4,32], index: 0, kind: input, shape index: {}]   ;;  %s292_s1 = inlined_call_operand.hbm [shape: f32[32,32], index: 1, kind: input, shape index: {}]   ;;  %s293_s2 = inlined_call_operand.vmem [shape: f32[1,32], index: 2, kind: input, shape index: {}]   ;;  %s294_s3 = inlined_call_operand.hbm [shape: f32[4,32], index: 3, kind: output, shape index: {}]  }
   0x1   :  { %9 = vsyncpa [#allocation6], 0 }
   0x2   :  { %10 = vsyncpa [#allocation4], 0 }
   0x3   :  { %15 = vsyncadd [#allocation3], 64  ;;  %s244_s12 = smov [#allocation2]  }
   0x4   :  { %s16_s13 = sshll.u32 %s244_s12, 4  ;;  %s17_s13 = int_to_ptr.vmem [resolvable:$true] %s16_s13 }
   0x5   :  { %s186_s14 = scalar_lea.vmem %s17_s13, 64  ;;  %s190_s15 = scalar_lea.vmem %s17_s13, 128 }
   0x6   :  { %p187_p0 = scmp.ne.s32.totalorder %s17_s13, %s186_s14  ;;  %p191_p1 = scmp.lt.s32.totalorder %s17_s13, %s17_s13 }
   0x7   :  { %p192_p2 = scmp.lt.s32.totalorder %s190_s15, %s186_s14 }
   0x9   :  { %p193_p3 = por %p192_p2, %p191_p1 }
   0xb   :  { %p194_p4 = pnand %p193_p3, %p187_p0 }
   0xd   :  { %197 = shalt.err (!%p194_p4)
}
   0xe   :  { %s245_s16 = smov 64   ;;  %s246_s17 = smov 4  }
   0xf   :  { %22 = dma.hbm_to_vmem [thread:$0]  %s291_s0, 64, %s17_s13, [#allocation3], %s245_s16, %s245_s16, %s246_s17  }
  0x10   :  { %s247_s20 = smov [#allocation5]  }
  0x11   :  { %s28_s21 = sshll.u32 %s247_s20, 4  ;;  %s29_s21 = int_to_ptr.vmem [resolvable:$true] %s28_s21 }
  0x12   :  { %s206_s22 = scalar_lea.vmem %s29_s21, 512  ;;  %p211_p6 = scmp.lt.s32.totalorder %s29_s21, %s29_s21 }
  0x13   :  { %p207_p5 = scmp.ne.s32.totalorder %s29_s21, %s206_s22  ;;  %p212_p7 = scmp.lt.s32.totalorder %s206_s22, %s206_s22 }
  0x15   :  { %p213_p8 = por %p212_p7, %p211_p6 }
  0x17   :  { %p214_p9 = pnand %p213_p8, %p207_p5 }
  0x19   :  { %217 = shalt.err (!%p214_p9)
}
  0x1a   :  { %s248_s23 = smov 128   ;;  %s249_s24 = smov 8  }
  0x1b   :  { %34 = dma.hbm_to_vmem [thread:$0]  %s292_s1, 512, %s29_s21, [#allocation6], %s248_s23, %s248_s23, %s249_s24  }
  0x1c   :  { %238 = dma.done.wait [#allocation3], 128  }
  0x1d   :  { %239 = vsyncadd [#allocation3], 4294967168 }
  0x1e   :  { %240 = dma.done.wait [#allocation6], 512  }
  0x1f   :  { %241 = vsyncadd [#allocation6], 4294966784  ;;  %v250_v0 = vmov 0.0   ;;  %vm251_vm0 = vmmov 0   ;;  %v47_v1 = vld [vmem:[#allocation5 + $0x18] sm:$0xff]  ;;  %v46_v2 = vld [vmem:[#allocation5 + $0x10] sm:$0xff] }
  0x20   :  { %156 = vmatprep.subr.mxu0 %v250_v0  ;;  %164 = vmatprep.mubr.msk.f32.mxu0 %vm251_vm0, %v250_v0  ;;  %v45_v3 = vld [vmem:[#allocation5 + $0x8] sm:$0xff]  ;;  %v44_v4 = vld [vmem:[#allocation5] sm:$0xff]  ;;  %v43_v5 = vld [vmem:[#allocation2] sm:$0xff]  ;;  %vm55_vm1 = vcmask 261120  }
  0x21   :  { %157 = vmatpush3.msra.mxu0 %v47_v1  ;;  %v149_v6 = vld [vmem:[%s293_s2] ss:$0 sm:$0xff] }
  0x22   :  { %158 = vmatprep.subr.mxu0 %v250_v0 }
  0x23   :  { %159 = vmatpush3.msra.mxu0 %v46_v2 }
  0x24   :  { %160 = vmatprep.subr.mxu0 %v250_v0 }
  0x25   :  { %161 = vmatpush3.msra.mxu0 %v45_v3 }
  0x26   :  { %162 = vmatprep.subr.mxu0 %v250_v0 }
  0x27   :  { %163 = vmatpush3.msra.mxu0 %v44_v4 }
  0x28   :  { %165 = vmatmul.mubr.msk.f32.vlgmr.msra.gmra.mxu0 %vm55_vm1, %v43_v5 }
  0xe8   :  { %v125_v7 = vpop.f32.mrf.mxu0 }
  0xe9   :  { %v126_v8 = vadd.f32 %v149_v6, %v125_v7 }
  0xea   :  { %v166_v9 = vpop.f32.mrf.mxu0 }
  0xeb   :  { %176 = vtanh.f32 %v126_v8 }
  0xf8   :  { %v177_v10 = vpop.eup %176 }
  0xf9   :  { %130 = vst.msk [vmem:[#allocation7] sm:$0xff] %vm55_vm1, %v177_v10 }
  0xfa   :  { %135 = vsyncadd [#allocation4], 64  ;;  %s252_s27 = smov [#allocation7]  }
  0xfb   :  { %s136_s28 = sshll.u32 %s252_s27, 4  ;;  %s137_s28 = int_to_ptr.vmem [resolvable:$true] %s136_s28 }
  0xfc   :  { %s218_s29 = scalar_lea.vmem %s137_s28, 64  ;;  %s222_s30 = scalar_lea.vmem %s137_s28, 128 }
  0xfd   :  { %p219_p10 = scmp.ne.s32.totalorder %s137_s28, %s218_s29  ;;  %p223_p11 = scmp.lt.s32.totalorder %s137_s28, %s137_s28 }
  0xfe   :  { %p224_p12 = scmp.lt.s32.totalorder %s222_s30, %s218_s29 }
 0x100   :  { %p225_p13 = por %p224_p12, %p223_p11 }
 0x102   :  { %p226_p0 = pnand %p225_p13, %p219_p10 }
 0x104   :  { %229 = shalt.err (!%p226_p0)
}
 0x105   :  { %142 = dma.vmem_to_hbm [thread:$0]  %s137_s28, 64, %s294_s3, [#allocation4], %s245_s16, %s245_s16, %s246_s17  }
 0x106   :  { %242 = dma.done.wait [#allocation4], 128  }
 0x107   :  { %243 = vsyncadd [#allocation4], 4294967168 }
 0x108   :  { %146 = vsyncpa [#allocation3], 1 }
 0x109   :  { %147 = vsyncpa [#allocation6], 1 }
 0x10a   :  { %148 = vsyncpa [#allocation4], 1 }

</bundles_post_ra>
